<compile_context>
chip_gen: v7x
topology: tpu7x:2x2x1
jax: 0.10.0
libtpu: 0.0.40
codegen_flags: <defaults>
</compile_context>

<pallas_src>
import math
from functools import partial

import jax
import jax.numpy as jnp
from jax import lax
from jax.experimental import pallas as pl
from jax.experimental.pallas import tpu as pltpu


# ----------------------------- small helpers --------------------------------

def _round_up(x, m):
    return ((x + m - 1) // m) * m


def _gelu(x, approximate=False):
    # torch nn.GELU() default is the exact erf formulation.
    if approximate:  # tanh approximation routes to the EUP slot (opt-in flag)
        c = math.sqrt(2.0 / math.pi)
        return 0.5 * x * (1.0 + jnp.tanh(c * (x + 0.044715 * x * x * x)))
    return 0.5 * x * (1.0 + lax.erf(x * (1.0 / math.sqrt(2.0))))


def _vmem_capacity_bytes():
    try:
        return int(pltpu.get_tpu_info().vmem_capacity_bytes)
    except Exception:
        return 64 * 1024 * 1024  # conservative default: v7x per-TensorCore VMEM


def _const_spec(shape, single_buffer):
    """BlockSpec for a VMEM-resident constant block (index never changes)."""
    idx = lambda *args: (0,) * len(shape)
    if single_buffer:
        try:
            # Single-buffer constant weight blocks (halves their VMEM footprint).
            return pl.BlockSpec(shape, idx, pipeline_mode=pl.Buffered(1))
        except Exception:
            pass  # older JAX without pipeline_mode -> default buffering
    return pl.BlockSpec(shape, idx)


# ------------------------------- kernels -------------------------------------

def _mlp_kernel_resident(x_ref, w1_ref, b1_ref, w2_ref, b2_ref, w3_ref, b3_ref,
                         mean_ref, *, approximate_gelu):
    # obs streamed in native dtype; matmuls in bf16 on the MXU, f32 accumulate.
    x = x_ref[...].astype(jnp.bfloat16)

    h = jnp.dot(x, w1_ref[...], preferred_element_type=jnp.float32) + b1_ref[...]
    h = _gelu(h, approximate_gelu).astype(jnp.bfloat16)

    h = jnp.dot(h, w2_ref[...], preferred_element_type=jnp.float32) + b2_ref[...]
    h = _gelu(h, approximate_gelu).astype(jnp.bfloat16)

    mean = jnp.dot(h, w3_ref[...], preferred_element_type=jnp.float32) + b3_ref[...]
    mean_ref[...] = mean.astype(mean_ref.dtype)


def _mlp_kernel_hidden_tiled(x_ref, w1_ref, b1_ref, w2_ref, b2_ref, w3_ref,
                             b3_ref, mean_ref, h1_scr, acc_scr, *,
                             approximate_gelu):
    # Fallback for large hidden: w2 is streamed over its output (N) dim; the
    # layer-3 reduction over hidden accumulates into an f32 scratch.
    n = pl.program_id(1)

    @pl.when(n == 0)
    def _():
        x = x_ref[...].astype(jnp.bfloat16)
        h1 = jnp.dot(x, w1_ref[...], preferred_element_type=jnp.float32) + b1_ref[...]
        h1_scr[...] = _gelu(h1, approximate_gelu).astype(jnp.bfloat16)
        acc_scr[...] = jnp.zeros_like(acc_scr)

    h2 = jnp.dot(h1_scr[...], w2_ref[...], preferred_element_type=jnp.float32) + b2_ref[...]
    h2 = _gelu(h2, approximate_gelu).astype(jnp.bfloat16)
    acc_scr[...] += jnp.dot(h2, w3_ref[...], preferred_element_type=jnp.float32)

    @pl.when(n == pl.num_programs(1) - 1)
    def _():
        mean_ref[...] = (acc_scr[...] + b3_ref[...]).astype(mean_ref.dtype)


# --------------------------- parameter preparation ---------------------------

def prepare_params(params, *, weights_dtype=jnp.bfloat16):
    """One-time pad/convert of GaussianMLP parameters (call once, reuse).

    Only the hidden dim is zero-padded (exact: GELU(0) == 0); obs_dim/act_dim
    stay unpadded so the streamed obs/mean arrays carry no padding traffic.
    Weights are stored in bf16 (f32 biases), halving their resident footprint.
    """
    w1, b1, w2, b2, w3, b3, log_std = params
    obs_dim, hidden = w1.shape
    act_dim = w3.shape[1]

    hid_p = _round_up(hidden, 128)
    if hid_p >= 1024:                      # v6e/v7x MXU is 256 wide
        hid_p = _round_up(hidden, 256)

    def pad_cols(a, cols):
        a = a.reshape(1, -1) if a.ndim == 1 else a
        return jnp.pad(a, ((0, 0), (0, cols - a.shape[1])))

    def pad2(a, rows, cols):
        return jnp.pad(a, ((0, rows - a.shape[0]), (0, cols - a.shape[1])))

    return dict(
        w1=pad2(w1, obs_dim, hid_p).astype(weights_dtype),
        b1=pad_cols(b1, hid_p).astype(jnp.float32),
        w2=pad2(w2, hid_p, hid_p).astype(weights_dtype),
        b2=pad_cols(b2, hid_p).astype(jnp.float32),
        w3=pad2(w3, hid_p, act_dim).astype(weights_dtype),
        b3=pad_cols(b3, act_dim).astype(jnp.float32),
        log_std=log_std.astype(jnp.float32),
        obs_dim=obs_dim, act_dim=act_dim, hidden=hidden, hid_p=hid_p,
    )


# -------------------------------- forward ------------------------------------

def gaussian_mlp_forward(obs, prepared, *, batch_tile=None,
                         approximate_gelu=False, force_hidden_tiling=False):
    """Fused GaussianMLP forward. Returns (mean, std) of the Normal dist."""
    p = prepared
    B, obs_dim = obs.shape
    assert obs_dim == p["obs_dim"], "obs feature dim mismatch with params"
    act_dim, hid_p = p["act_dim"], p["hid_p"]
    out_dtype = obs.dtype
    wbytes = jnp.dtype(p["w1"].dtype).itemsize

    vmem_cap = _vmem_capacity_bytes()

    # ---- batch tile: VMEM-capped, >=2 grid steps for medium/large batches ---
    B8 = _round_up(B, 8)
    act_budget = int(0.35 * vmem_cap)
    tb_cap = max(128, min(2048, (act_budget // (4 * hid_p * 4)) // 128 * 128))
    if batch_tile is not None:
        tb_cap = batch_tile
    if B8 < 64:
        TB = B8                                  # single step; block == full dim
    else:
        steps = 2 if B8 < 256 else (4 if B8 < 1024 else 8)
        TB = _round_up((B8 + steps - 1) // steps, 16)
        TB = max(16, min(TB, tb_cap))
    B_pad = _round_up(B8, TB)
    obs_in = obs if B_pad == B else jnp.pad(obs, ((0, B_pad - B), (0, 0)))

    # ---- resident-weights vs hidden-tiled fallback --------------------------
    resident_w = ((obs_dim * hid_p + hid_p * hid_p + hid_p * act_dim) * wbytes
                  + (2 * hid_p + act_dim) * 4)
    use_tiled = force_hidden_tiling or (resident_w > 0.35 * vmem_cap)
    TN = 512 if hid_p % 512 == 0 else (256 if hid_p % 256 == 0 else 128)

    # ---- VMEM budget ---------------------------------------------------------
    io_bytes = 2 * TB * (obs_dim * obs.dtype.itemsize
                         + act_dim * jnp.dtype(out_dtype).itemsize)
    act_bytes = 4 * TB * hid_p * 4
    if use_tiled:
        w_stream = 2 * (hid_p * TN + TN * act_dim) * wbytes + 2 * TN * 4
        w_res = obs_dim * hid_p * wbytes + (hid_p + act_dim) * 4
        scratch_bytes = TB * hid_p * 2 + TB * act_dim * 4
        budget = w_stream + w_res + scratch_bytes + io_bytes + act_bytes
    else:
        budget = resident_w + io_bytes + act_bytes
    vmem_limit = min(max(int(1.4 * budget), 32 * 1024 * 1024),
                     int(0.8 * vmem_cap))

    weight_args = (p["w1"], p["b1"], p["w2"], p["b2"], p["w3"], p["b3"])

    def run(single_buffer):
        if not use_tiled:
            kernel = partial(_mlp_kernel_resident,
                             approximate_gelu=approximate_gelu)
            in_specs = [pl.BlockSpec((TB, obs_dim), lambda i: (i, 0))]
            in_specs += [_const_spec(w.shape, single_buffer) for w in weight_args]
            return pl.pallas_call(
                kernel,
                out_shape=jax.ShapeDtypeStruct((B_pad, act_dim), out_dtype),
                grid=(B_pad // TB,),
                in_specs=in_specs,
                out_specs=pl.BlockSpec((TB, act_dim), lambda i: (i, 0)),
                compiler_params=pltpu.CompilerParams(
                    dimension_semantics=("parallel",),
                    vmem_limit_bytes=vmem_limit,
                ),
            )(obs_in, *weight_args)

        kernel = partial(_mlp_kernel_hidden_tiled,
                         approximate_gelu=approximate_gelu)
        in_specs = [
            pl.BlockSpec((TB, obs_dim), lambda i, n: (i, 0)),
            _const_spec(p["w1"].shape, single_buffer),
            _const_spec(p["b1"].shape, single_buffer),
            pl.BlockSpec((hid_p, TN), lambda i, n: (0, n)),
            pl.BlockSpec((1, TN), lambda i, n: (0, n)),
            pl.BlockSpec((TN, act_dim), lambda i, n: (n, 0)),
            _const_spec(p["b3"].shape, single_buffer),
        ]
        return pl.pallas_call(
            kernel,
            out_shape=jax.ShapeDtypeStruct((B_pad, act_dim), out_dtype),
            grid=(B_pad // TB, hid_p // TN),
            in_specs=in_specs,
            out_specs=pl.BlockSpec((TB, act_dim), lambda i, n: (i, 0)),
            scratch_shapes=[pltpu.VMEM((TB, hid_p), jnp.bfloat16),
                            pltpu.VMEM((TB, act_dim), jnp.float32)],
            compiler_params=pltpu.CompilerParams(
                dimension_semantics=("parallel", "arbitrary"),
                vmem_limit_bytes=vmem_limit,
            ),
        )(obs_in, *weight_args)

    try:
        mean_pad = run(single_buffer=True)
    except Exception:
        # pl.Buffered(1) not supported by this JAX/Mosaic version: fall back to
        # the default double-buffered constant blocks.
        mean_pad = run(single_buffer=False)

    mean = mean_pad if B_pad == B else mean_pad[:B]
    # std = exp(log_std) is obs-independent: plain XLA op outside the kernel.
    std = jnp.broadcast_to(jnp.exp(p["log_std"]).astype(mean.dtype), mean.shape)
    return mean, std


# --------------------------- init + pure-JAX reference -----------------------

def init_params(key, obs_dim, act_dim, hidden_size):
    """Deterministic init mimicking nn.Linear's uniform(-1/sqrt(fan_in), +...)."""
    ks = jax.random.split(key, 6)

    def linear(kw, kb, fan_in, fan_out):
        bound = 1.0 / math.sqrt(fan_in)
        w = jax.random.uniform(kw, (fan_in, fan_out), jnp.float32, -bound, bound)
        b = jax.random.uniform(kb, (fan_out,), jnp.float32, -bound, bound)
        return w, b

    w1, b1 = linear(ks[0], ks[1], obs_dim, hidden_size)
    w2, b2 = linear(ks[2], ks[3], hidden_size, hidden_size)
    w3, b3 = linear(ks[4], ks[5], hidden_size, act_dim)
    log_std = jnp.zeros((act_dim,), jnp.float32)   # nn.Parameter(torch.zeros(act_dim))
    return (w1, b1, w2, b2, w3, b3, log_std)


def reference_forward(obs, params):
    w1, b1, w2, b2, w3, b3, log_std = params
    h = _gelu(obs @ w1 + b1)
    h = _gelu(h @ w2 + b2)
    mean = h @ w3 + b3
    std = jnp.broadcast_to(jnp.exp(log_std), mean.shape)
    return mean, std


# ----------------------------------- main -------------------------------------

if __name__ == "__main__":
    key = jax.random.PRNGKey(0)
    k_obs, k_par, k2, k3 = jax.random.split(key, 4)

    # Case 1: spec-sized shapes, resident-weight path, single batch tile.
    obs_dim, act_dim, hidden_size, batch = 16, 8, 32, 8
    params = init_params(k_par, obs_dim, act_dim, hidden_size)
    prepared = prepare_params(params)          # one-time pad/convert (bf16)

    obs = jax.random.normal(k_obs, (batch, obs_dim), jnp.float32)
    mean, std = gaussian_mlp_forward(obs, prepared)
    jax.block_until_ready((mean, std))

    ref_mean, ref_std = reference_forward(obs, params)
    assert mean.shape == ref_mean.shape and std.shape == ref_std.shape
    assert jnp.allclose(mean, ref_mean, atol=3e-2, rtol=3e-2), "mean mismatch"
    assert jnp.allclose(std, ref_std, atol=1e-6, rtol=1e-6), "std mismatch"

    # Case 2: medium batch -> multi-step batch grid (megacore-splittable on v7x).
    obs2 = jax.random.normal(k2, (192, obs_dim), jnp.float32)
    mean2, std2 = gaussian_mlp_forward(obs2, prepared)
    jax.block_until_ready((mean2, std2))
    ref_m2, _ = reference_forward(obs2, params)
    assert mean2.shape == ref_m2.shape
    assert jnp.allclose(mean2, ref_m2, atol=3e-2, rtol=3e-2), "mean mismatch (B=192)"

    # Case 3: ragged batch + forced hidden-tiled fallback path (multi n-steps).
    hidden3 = 300
    params3 = init_params(k_par, obs_dim, act_dim, hidden3)
    prepared3 = prepare_params(params3)
    obs3 = jax.random.normal(k3, (37, obs_dim), jnp.float32)
    mean3, std3 = gaussian_mlp_forward(obs3, prepared3, force_hidden_tiling=True)
    jax.block_until_ready((mean3, std3))
    ref_m3, ref_s3 = reference_forward(obs3, params3)
    assert mean3.shape == ref_m3.shape
    assert jnp.allclose(mean3, ref_m3, atol=3e-2, rtol=3e-2), "mean mismatch (tiled)"
    assert jnp.allclose(std3, ref_s3, atol=1e-6, rtol=1e-6), "std mismatch (tiled)"

    print("KERNEL_OK")
</pallas_src>

<mosaic_0001>
module attributes {stable_mosaic.version = 11 : i64} {
  func.func @_mlp_kernel_resident(%arg0: i32, %arg1: memref<8x16xf32, #tpu.memory_space<vmem>>, %arg2: memref<16x128xbf16, #tpu.memory_space<vmem>>, %arg3: memref<1x128xf32, #tpu.memory_space<vmem>>, %arg4: memref<128x128xbf16, #tpu.memory_space<vmem>>, %arg5: memref<1x128xf32, #tpu.memory_space<vmem>>, %arg6: memref<128x8xbf16, #tpu.memory_space<vmem>>, %arg7: memref<1x8xf32, #tpu.memory_space<vmem>>, %arg8: memref<8x8xf32, #tpu.memory_space<vmem>>) attributes {dimension_semantics = [#tpu.dimension_semantics<parallel>], iteration_bounds = array<i64: 1>, scalar_prefetch = 0 : i64, scratch_operands = 0 : i64, tpu.core_type = #tpu.core_type<tc>, window_params = [{transform_indices = @transform_0, window_bounds = array<i64: 8, 16>}, {pipeline_mode = #tpu.pipeline_mode<synchronous>, transform_indices = @transform_1, window_bounds = array<i64: 16, 128>}, {pipeline_mode = #tpu.pipeline_mode<synchronous>, transform_indices = @transform_2, window_bounds = array<i64: 1, 128>}, {pipeline_mode = #tpu.pipeline_mode<synchronous>, transform_indices = @transform_3, window_bounds = array<i64: 128, 128>}, {pipeline_mode = #tpu.pipeline_mode<synchronous>, transform_indices = @transform_4, window_bounds = array<i64: 1, 128>}, {pipeline_mode = #tpu.pipeline_mode<synchronous>, transform_indices = @transform_5, window_bounds = array<i64: 128, 8>}, {pipeline_mode = #tpu.pipeline_mode<synchronous>, transform_indices = @transform_6, window_bounds = array<i64: 1, 8>}, {transform_indices = @transform_7, window_bounds = array<i64: 8, 8>}]} {
    %c0 = arith.constant 0 : index
    %c0_0 = arith.constant 0 : index
    %0 = vector.load %arg1[%c0, %c0_0] : memref<8x16xf32, #tpu.memory_space<vmem>>, vector<8x16xf32>
    %1 = arith.truncf %0 : vector<8x16xf32> to vector<8x16xbf16>
    %c0_1 = arith.constant 0 : index
    %c0_2 = arith.constant 0 : index
    %2 = vector.load %arg2[%c0_1, %c0_2] : memref<16x128xbf16, #tpu.memory_space<vmem>>, vector<16x128xbf16>
    %cst = arith.constant dense<0.000000e+00> : vector<8x128xf32>
    %3 = tpu.matmul %1, %2, %cst {dimension_numbers = #tpu.dot_dimension_numbers<[1], [0], [0], [1], [0, 0, 1, 1], [], []>} : vector<8x16xbf16>, vector<16x128xbf16>, vector<8x128xf32> -> vector<8x128xf32>
    %c0_3 = arith.constant 0 : index
    %c0_4 = arith.constant 0 : index
    %4 = vector.load %arg3[%c0_3, %c0_4] : memref<1x128xf32, #tpu.memory_space<vmem>>, vector<1x128xf32>
    %5 = vector.broadcast %4 : vector<1x128xf32> to vector<8x128xf32>
    %6 = arith.addf %3, %5 : vector<8x128xf32>
    %cst_5 = arith.constant 5.000000e-01 : f32
    %7 = vector.broadcast %cst_5 : f32 to vector<8x128xf32>
    %8 = arith.mulf %7, %6 : vector<8x128xf32>
    %cst_6 = arith.constant 0.707106769 : f32
    %9 = vector.broadcast %cst_6 : f32 to vector<8x128xf32>
    %10 = arith.mulf %6, %9 : vector<8x128xf32>
    %11 = math.erf %10 : vector<8x128xf32>
    %cst_7 = arith.constant 1.000000e+00 : f32
    %12 = vector.broadcast %cst_7 : f32 to vector<8x128xf32>
    %13 = arith.addf %12, %11 : vector<8x128xf32>
    %14 = arith.mulf %8, %13 : vector<8x128xf32>
    %15 = arith.truncf %14 : vector<8x128xf32> to vector<8x128xbf16>
    %c0_8 = arith.constant 0 : index
    %c0_9 = arith.constant 0 : index
    %16 = vector.load %arg4[%c0_8, %c0_9] : memref<128x128xbf16, #tpu.memory_space<vmem>>, vector<128x128xbf16>
    %cst_10 = arith.constant dense<0.000000e+00> : vector<8x128xf32>
    %17 = tpu.matmul %15, %16, %cst_10 {dimension_numbers = #tpu.dot_dimension_numbers<[1], [0], [0], [1], [0, 0, 1, 1], [], []>} : vector<8x128xbf16>, vector<128x128xbf16>, vector<8x128xf32> -> vector<8x128xf32>
    %c0_11 = arith.constant 0 : index
    %c0_12 = arith.constant 0 : index
    %18 = vector.load %arg5[%c0_11, %c0_12] : memref<1x128xf32, #tpu.memory_space<vmem>>, vector<1x128xf32>
    %19 = vector.broadcast %18 : vector<1x128xf32> to vector<8x128xf32>
    %20 = arith.addf %17, %19 : vector<8x128xf32>
    %cst_13 = arith.constant 5.000000e-01 : f32
    %21 = vector.broadcast %cst_13 : f32 to vector<8x128xf32>
    %22 = arith.mulf %21, %20 : vector<8x128xf32>
    %cst_14 = arith.constant 0.707106769 : f32
    %23 = vector.broadcast %cst_14 : f32 to vector<8x128xf32>
    %24 = arith.mulf %20, %23 : vector<8x128xf32>
    %25 = math.erf %24 : vector<8x128xf32>
    %cst_15 = arith.constant 1.000000e+00 : f32
    %26 = vector.broadcast %cst_15 : f32 to vector<8x128xf32>
    %27 = arith.addf %26, %25 : vector<8x128xf32>
    %28 = arith.mulf %22, %27 : vector<8x128xf32>
    %29 = arith.truncf %28 : vector<8x128xf32> to vector<8x128xbf16>
    %c0_16 = arith.constant 0 : index
    %c0_17 = arith.constant 0 : index
    %30 = vector.load %arg6[%c0_16, %c0_17] : memref<128x8xbf16, #tpu.memory_space<vmem>>, vector<128x8xbf16>
    %cst_18 = arith.constant dense<0.000000e+00> : vector<8x8xf32>
    %31 = tpu.matmul %29, %30, %cst_18 {dimension_numbers = #tpu.dot_dimension_numbers<[1], [0], [0], [1], [0, 0, 1, 1], [], []>} : vector<8x128xbf16>, vector<128x8xbf16>, vector<8x8xf32> -> vector<8x8xf32>
    %c0_19 = arith.constant 0 : index
    %c0_20 = arith.constant 0 : index
    %32 = vector.load %arg7[%c0_19, %c0_20] : memref<1x8xf32, #tpu.memory_space<vmem>>, vector<1x8xf32>
    %33 = vector.broadcast %32 : vector<1x8xf32> to vector<8x8xf32>
    %34 = arith.addf %31, %33 : vector<8x8xf32>
    %c0_21 = arith.constant 0 : index
    %c0_22 = arith.constant 0 : index
    %35 = vector.load %arg8[%c0_21, %c0_22] : memref<8x8xf32, #tpu.memory_space<vmem>>, vector<8x8xf32>
    tpu.vector_store %arg8[%c0_21, %c0_22], %34 {strides = array<i32>} : memref<8x8xf32, #tpu.memory_space<vmem>>, vector<8x8xf32>,
    return
  }
  func.func @transform_0(%arg0: i32) -> (i32, i32) {
    %c0_i32 = arith.constant 0 : i32
    %c0_i32_0 = arith.constant 0 : i32
    return %arg0, %c0_i32 : i32, i32
  }
  func.func @transform_1(%arg0: i32) -> (i32, i32) {
    %c0_i32 = arith.constant 0 : i32
    %c0_i32_0 = arith.constant 0 : i32
    %c0_i32_1 = arith.constant 0 : i32
    return %c0_i32, %c0_i32_0 : i32, i32
  }
  func.func @transform_2(%arg0: i32) -> (i32, i32) {
    %c0_i32 = arith.constant 0 : i32
    %c0_i32_0 = arith.constant 0 : i32
    %c0_i32_1 = arith.constant 0 : i32
    return %c0_i32, %c0_i32_0 : i32, i32
  }
  func.func @transform_3(%arg0: i32) -> (i32, i32) {
    %c0_i32 = arith.constant 0 : i32
    %c0_i32_0 = arith.constant 0 : i32
    %c0_i32_1 = arith.constant 0 : i32
    return %c0_i32, %c0_i32_0 : i32, i32
  }
  func.func @transform_4(%arg0: i32) -> (i32, i32) {
    %c0_i32 = arith.constant 0 : i32
    %c0_i32_0 = arith.constant 0 : i32
    %c0_i32_1 = arith.constant 0 : i32
    return %c0_i32, %c0_i32_0 : i32, i32
  }
  func.func @transform_5(%arg0: i32) -> (i32, i32) {
    %c0_i32 = arith.constant 0 : i32
    %c0_i32_0 = arith.constant 0 : i32
    %c0_i32_1 = arith.constant 0 : i32
    return %c0_i32, %c0_i32_0 : i32, i32
  }
  func.func @transform_6(%arg0: i32) -> (i32, i32) {
    %c0_i32 = arith.constant 0 : i32
    %c0_i32_0 = arith.constant 0 : i32
    %c0_i32_1 = arith.constant 0 : i32
    return %c0_i32, %c0_i32_0 : i32, i32
  }
  func.func @transform_7(%arg0: i32) -> (i32, i32) {
    %c0_i32 = arith.constant 0 : i32
    %c0_i32_0 = arith.constant 0 : i32
    return %arg0, %c0_i32 : i32, i32
  }
}

module attributes {stable_mosaic.version = 11 : i64} {
  func.func @_mlp_kernel_resident(%arg0: i32, %arg1: memref<8x16xf32, #tpu.memory_space<vmem>>, %arg2: memref<16x128xbf16, #tpu.memory_space<vmem>>, %arg3: memref<1x128xf32, #tpu.memory_space<vmem>>, %arg4: memref<128x128xbf16, #tpu.memory_space<vmem>>, %arg5: memref<1x128xf32, #tpu.memory_space<vmem>>, %arg6: memref<128x8xbf16, #tpu.memory_space<vmem>>, %arg7: memref<1x8xf32, #tpu.memory_space<vmem>>, %arg8: memref<8x8xf32, #tpu.memory_space<vmem>>) attributes {dimension_semantics = [#tpu.dimension_semantics<parallel>], iteration_bounds = array<i64: 1>, scalar_prefetch = 0 : i64, scratch_operands = 0 : i64, tpu.core_type = #tpu.core_type<tc>, window_params = [{transform_indices = @transform_0, window_bounds = array<i64: 8, 16>}, {pipeline_mode = #tpu.pipeline_mode<synchronous>, transform_indices = @transform_1, window_bounds = array<i64: 16, 128>}, {pipeline_mode = #tpu.pipeline_mode<synchronous>, transform_indices = @transform_2, window_bounds = array<i64: 1, 128>}, {pipeline_mode = #tpu.pipeline_mode<synchronous>, transform_indices = @transform_3, window_bounds = array<i64: 128, 128>}, {pipeline_mode = #tpu.pipeline_mode<synchronous>, transform_indices = @transform_4, window_bounds = array<i64: 1, 128>}, {pipeline_mode = #tpu.pipeline_mode<synchronous>, transform_indices = @transform_5, window_bounds = array<i64: 128, 8>}, {pipeline_mode = #tpu.pipeline_mode<synchronous>, transform_indices = @transform_6, window_bounds = array<i64: 1, 8>}, {transform_indices = @transform_7, window_bounds = array<i64: 8, 8>}]} {
    %c0 = arith.constant 0 : index
    %c0_0 = arith.constant 0 : index
    %0 = vector.load %arg1[%c0, %c0_0] : memref<8x16xf32, #tpu.memory_space<vmem>>, vector<8x16xf32>
    %1 = arith.truncf %0 : vector<8x16xf32> to vector<8x16xbf16>
    %c0_1 = arith.constant 0 : index
    %c0_2 = arith.constant 0 : index
    %2 = vector.load %arg2[%c0_1, %c0_2] : memref<16x128xbf16, #tpu.memory_space<vmem>>, vector<16x128xbf16>
    %cst = arith.constant dense<0.000000e+00> : vector<8x128xf32>
    %3 = tpu.matmul %1, %2, %cst {dimension_numbers = #tpu.dot_dimension_numbers<[1], [0], [0], [1], [0, 0, 1, 1], [], []>} : vector<8x16xbf16>, vector<16x128xbf16>, vector<8x128xf32> -> vector<8x128xf32>
    %c0_3 = arith.constant 0 : index
    %c0_4 = arith.constant 0 : index
    %4 = vector.load %arg3[%c0_3, %c0_4] : memref<1x128xf32, #tpu.memory_space<vmem>>, vector<1x128xf32>
    %5 = vector.broadcast %4 : vector<1x128xf32> to vector<8x128xf32>
    %6 = arith.addf %3, %5 : vector<8x128xf32>
    %cst_5 = arith.constant 5.000000e-01 : f32
    %7 = vector.broadcast %cst_5 : f32 to vector<8x128xf32>
    %8 = arith.mulf %7, %6 : vector<8x128xf32>
    %cst_6 = arith.constant 0.707106769 : f32
    %9 = vector.broadcast %cst_6 : f32 to vector<8x128xf32>
    %10 = arith.mulf %6, %9 : vector<8x128xf32>
    %11 = math.erf %10 : vector<8x128xf32>
    %cst_7 = arith.constant 1.000000e+00 : f32
    %12 = vector.broadcast %cst_7 : f32 to vector<8x128xf32>
    %13 = arith.addf %12, %11 : vector<8x128xf32>
    %14 = arith.mulf %8, %13 : vector<8x128xf32>
    %15 = arith.truncf %14 : vector<8x128xf32> to vector<8x128xbf16>
    %c0_8 = arith.constant 0 : index
    %c0_9 = arith.constant 0 : index
    %16 = vector.load %arg4[%c0_8, %c0_9] : memref<128x128xbf16, #tpu.memory_space<vmem>>, vector<128x128xbf16>
    %cst_10 = arith.constant dense<0.000000e+00> : vector<8x128xf32>
    %17 = tpu.matmul %15, %16, %cst_10 {dimension_numbers = #tpu.dot_dimension_numbers<[1], [0], [0], [1], [0, 0, 1, 1], [], []>} : vector<8x128xbf16>, vector<128x128xbf16>, vector<8x128xf32> -> vector<8x128xf32>
    %c0_11 = arith.constant 0 : index
    %c0_12 = arith.constant 0 : index
    %18 = vector.load %arg5[%c0_11, %c0_12] : memref<1x128xf32, #tpu.memory_space<vmem>>, vector<1x128xf32>
    %19 = vector.broadcast %18 : vector<1x128xf32> to vector<8x128xf32>
    %20 = arith.addf %17, %19 : vector<8x128xf32>
    %cst_13 = arith.constant 5.000000e-01 : f32
    %21 = vector.broadcast %cst_13 : f32 to vector<8x128xf32>
    %22 = arith.mulf %21, %20 : vector<8x128xf32>
    %cst_14 = arith.constant 0.707106769 : f32
    %23 = vector.broadcast %cst_14 : f32 to vector<8x128xf32>
    %24 = arith.mulf %20, %23 : vector<8x128xf32>
    %25 = math.erf %24 : vector<8x128xf32>
    %cst_15 = arith.constant 1.000000e+00 : f32
    %26 = vector.broadcast %cst_15 : f32 to vector<8x128xf32>
    %27 = arith.addf %26, %25 : vector<8x128xf32>
    %28 = arith.mulf %22, %27 : vector<8x128xf32>
    %29 = arith.truncf %28 : vector<8x128xf32> to vector<8x128xbf16>
    %c0_16 = arith.constant 0 : index
    %c0_17 = arith.constant 0 : index
    %30 = vector.load %arg6[%c0_16, %c0_17] : memref<128x8xbf16, #tpu.memory_space<vmem>>, vector<128x8xbf16>
    %cst_18 = arith.constant dense<0.000000e+00> : vector<8x8xf32>
    %31 = tpu.matmul %29, %30, %cst_18 {dimension_numbers = #tpu.dot_dimension_numbers<[1], [0], [0], [1], [0, 0, 1, 1], [], []>} : vector<8x128xbf16>, vector<128x8xbf16>, vector<8x8xf32> -> vector<8x8xf32>
    %c0_19 = arith.constant 0 : index
    %c0_20 = arith.constant 0 : index
    %32 = vector.load %arg7[%c0_19, %c0_20] : memref<1x8xf32, #tpu.memory_space<vmem>>, vector<1x8xf32>
    %33 = vector.broadcast %32 : vector<1x8xf32> to vector<8x8xf32>
    %34 = arith.addf %31, %33 : vector<8x8xf32>
    %c0_21 = arith.constant 0 : index
    %c0_22 = arith.constant 0 : index
    %35 = vector.load %arg8[%c0_21, %c0_22] : memref<8x8xf32, #tpu.memory_space<vmem>>, vector<8x8xf32>
    tpu.vector_store %arg8[%c0_21, %c0_22], %34 {strides = array<i32>} : memref<8x8xf32, #tpu.memory_space<vmem>>, vector<8x8xf32>,
    return
  }
  func.func @transform_0(%arg0: i32) -> (i32, i32) {
    %c0_i32 = arith.constant 0 : i32
    %c0_i32_0 = arith.constant 0 : i32
    return %arg0, %c0_i32 : i32, i32
  }
  func.func @transform_1(%arg0: i32) -> (i32, i32) {
    %c0_i32 = arith.constant 0 : i32
    %c0_i32_0 = arith.constant 0 : i32
    %c0_i32_1 = arith.constant 0 : i32
    return %c0_i32, %c0_i32_0 : i32, i32
  }
  func.func @transform_2(%arg0: i32) -> (i32, i32) {
    %c0_i32 = arith.constant 0 : i32
    %c0_i32_0 = arith.constant 0 : i32
    %c0_i32_1 = arith.constant 0 : i32
    return %c0_i32, %c0_i32_0 : i32, i32
  }
  func.func @transform_3(%arg0: i32) -> (i32, i32) {
    %c0_i32 = arith.constant 0 : i32
    %c0_i32_0 = arith.constant 0 : i32
    %c0_i32_1 = arith.constant 0 : i32
    return %c0_i32, %c0_i32_0 : i32, i32
  }
  func.func @transform_4(%arg0: i32) -> (i32, i32) {
    %c0_i32 = arith.constant 0 : i32
    %c0_i32_0 = arith.constant 0 : i32
    %c0_i32_1 = arith.constant 0 : i32
    return %c0_i32, %c0_i32_0 : i32, i32
  }
  func.func @transform_5(%arg0: i32) -> (i32, i32) {
    %c0_i32 = arith.constant 0 : i32
    %c0_i32_0 = arith.constant 0 : i32
    %c0_i32_1 = arith.constant 0 : i32
    return %c0_i32, %c0_i32_0 : i32, i32
  }
  func.func @transform_6(%arg0: i32) -> (i32, i32) {
    %c0_i32 = arith.constant 0 : i32
    %c0_i32_0 = arith.constant 0 : i32
    %c0_i32_1 = arith.constant 0 : i32
    return %c0_i32, %c0_i32_0 : i32, i32
  }
  func.func @transform_7(%arg0: i32) -> (i32, i32) {
    %c0_i32 = arith.constant 0 : i32
    %c0_i32_0 = arith.constant 0 : i32
    return %arg0, %c0_i32 : i32, i32
  }
}

</mosaic_0001>

<bundles_post_ra>
// kernel: tpu_custom_call.1
= control target key start
LH: loop header
LB: loop body
LE: loop exit
PB: predicated region body
PF: predicated region fallthrough
CT: control target
= control target key end

     0   :  { %12 = vsyncpa [#allocation3], 0  ;;  %s669_s0 = inlined_call_operand.vmem [shape: f32[8,16], index: 0, kind: input, shape index: {}]   ;;  %s670_s1 = inlined_call_operand.hbm [shape: bf16[16,128], index: 1, kind: input, shape index: {}]   ;;  %s671_s2 = inlined_call_operand.vmem [shape: f32[1,128], index: 2, kind: input, shape index: {}]   ;;  %s672_s3 = inlined_call_operand.vmem [shape: bf16[128,128], index: 3, kind: input, shape index: {}]   ;;  %s673_s4 = inlined_call_operand.vmem [shape: f32[1,128], index: 4, kind: input, shape index: {}]   ;;  %s674_s5 = inlined_call_operand.vmem [shape: bf16[128,8], index: 5, kind: input, shape index: {}]   ;;  %s675_s6 = inlined_call_operand.vmem [shape: f32[1,8], index: 6, kind: input, shape index: {}]   ;;  %s676_s7 = inlined_call_operand.hbm [shape: f32[8,8], index: 7, kind: output, shape index: {}]  }
   0x1   :  { %13 = vsyncpa [#allocation4], 0  ;;  %s516_s24 = smov [#allocation2]   ;;  %s468_s28 = scalar_lea.hbm %s670_s1, 128 }
   0x2   :  { %s21_s25 = sshll.u32 %s516_s24, 4  ;;  %p469_p0 = scmp.ne.s32.totalorder %s670_s1, %s468_s28  ;;  %s22_s25 = int_to_ptr.vmem [resolvable:$true] %s21_s25 }
   0x3   :  { %p472_p1 = scmp.lt.u32.totalorder %s468_s28, %s670_s1 }
   0x5   :  { %p474_p2 = pnand %p472_p1, %p469_p0 }
   0x7   :  { %477 = shalt.err (!%p474_p2)
}
   0x8   :  { %s478_s10 = scalar_lea.vmem %s22_s25, 128  ;;  %p483_p4 = scmp.lt.s32.totalorder %s22_s25, %s22_s25 }
   0x9   :  { %p479_p3 = scmp.ne.s32.totalorder %s22_s25, %s478_s10  ;;  %p484_p5 = scmp.lt.s32.totalorder %s478_s10, %s478_s10 }
   0xb   :  { %p485_p6 = por %p484_p5, %p483_p4 }
   0xd   :  { %p486_p7 = pnand %p485_p6, %p479_p3 }
   0xf   :  { %489 = shalt.err (!%p486_p7)
}
  0x10   :  { %s517_s11 = smov 64   ;;  %s518_s12 = smov 4  }
  0x11   :  { %27 = dma.hbm_to_vmem [thread:$0]  %s670_s1, 128, %s22_s25, [#allocation3], %s517_s11, %s517_s11, %s518_s12  }
  0x12   :  { %512 = dma.done.wait [#allocation3], 128  }
  0x13   :  { %513 = vsyncadd [#allocation3], 4294967168  ;;  %v519_v0 = vmov 0.0   ;;  %vm520_vm0 = vmmov 0   ;;  %v447_v1 = vld [vmem:[#allocation2] sm:$0xff]   ;;  %vm59_vm1 = vcmask 130048  }
  0x14   :  { %395 = vmatprep.subr.bf16.mxu0 %v519_v0  ;;  %397 = vmatprep.mubr.msk.bf16.mxu0 %vm520_vm0, %v519_v0  ;;  %v42_v2 = vld [vmem:[%s669_s0] sm:$0xff]  ;;  %v449_v5 = vld [vmem:[%s672_s3 + $0x8] sm:$0xff]   ;;  %v450_v6 = vld [vmem:[%s672_s3 + $0x10] sm:$0xff]   ;;  %s521_s25 = smov [#allocation5]   ;;  %vm337_vm2 = vcmask 64512  }
  0x15   :  { %401 = vmatprep.subr.bf16.mxu1 %v519_v0  ;;  %417 = vmatprep.mubr.msk.bf16.mxu1 %vm520_vm0, %v519_v0  ;;  %v43_v3 = vpack.c.bf16 %v42_v2, %v42_v2  ;;  %v448_v4 = vld [vmem:[%s672_s3] sm:$0xff]   ;;  %v451_v7 = vld [vmem:[%s672_s3 + $0x18] sm:$0xff]   ;;  %v453_v9 = vld [vmem:[%s672_s3 + $0x28] sm:$0xff]   ;;  %s345_s26 = sshll.u32 %s521_s25, 4  ;;  %s346_s26 = int_to_ptr.vmem [resolvable:$true] %s345_s26 }
  0x16   :  { %396 = vmatpush3.bf16.msra.mxu0 %v447_v1  ;;  %402 = vmatpush3.bf16.msra.mxu1 %v448_v4  ;;  %v452_v8 = vld [vmem:[%s672_s3 + $0x20] sm:$0xff]   ;;  %v454_v10 = vld [vmem:[%s672_s3 + $0x30] sm:$0xff]   ;;  %v455_v11 = vld [vmem:[%s672_s3 + $0x38] sm:$0xff]   ;;  %p495_p9 = scmp.lt.s32.totalorder %s346_s26, %s346_s26 }
  0x17   :  { %421 = vmatprep.subr.bf16.mxu0 %v519_v0  ;;  %403 = vmatprep.subr.bf16.mxu1 %v519_v0  ;;  %v456_v12 = vld [vmem:[%s674_s5] sm:$0xff]   ;;  %v457_v13 = vld [vmem:[%s674_s5 + $0x8] sm:$0xff]   ;;  %v458_v14 = vld [vmem:[%s674_s5 + $0x10] sm:$0xff]  }
  0x18   :  { %v354_v15 = vld [vmem:[%s671_s2] ss:$0 sm:$0xff]  ;;  %v459_v27 = vld [vmem:[%s674_s5 + $0x18] sm:$0xff]   ;;  %v461_v29 = vld [vmem:[%s674_s5 + $0x28] sm:$0xff]  }
  0x19   :  { %398 = vmatmul.mubr.msk.bf16.vlgmr.msra.gmra.mrb[0].mxu0 %vm59_vm1, %v43_v3  ;;  %v460_v28 = vld [vmem:[%s674_s5 + $0x20] sm:$0xff]   ;;  %v462_v30 = vld [vmem:[%s674_s5 + $0x30] sm:$0xff]   ;;  %v463_v31 = vld [vmem:[%s674_s5 + $0x38] sm:$0xff]  }
  0x1a   :  { %437 = vmatprep.mubr.msk.bf16.mxu0 %vm520_vm0, %v519_v0  ;;  %404 = vmatpush3.bf16.msra.mxu1 %v449_v5  ;;  %v357_v32 = vld [vmem:[%s673_s4] ss:$0 sm:$0xff]  ;;  %s490_s4 = scalar_lea.vmem %s346_s26, 128 }
  0x1b   :  { %405 = vmatprep.subr.bf16.mxu1 %v519_v0  ;;  %422 = vmatpush3.bf16.msra.mxu0 %v456_v12  ;;  %v366_v44 = vld [vmem:[%s675_s6] ss:$0 sm:$0xff]  ;;  %p491_p8 = scmp.ne.s32.totalorder %s346_s26, %s490_s4  ;;  %p496_p10 = scmp.lt.s32.totalorder %s490_s4, %s490_s4 }
  0x1c   :  { %423 = vmatprep.subr.bf16.mxu0 %v519_v0 }
  0x1d   :  { %p497_p11 = por %p496_p10, %p495_p9 }
  0x1e   :  { %406 = vmatpush3.bf16.msra.mxu1 %v450_v6 }
  0x1f   :  { %407 = vmatprep.subr.bf16.mxu1 %v519_v0  ;;  %424 = vmatpush3.bf16.msra.mxu0 %v457_v13  ;;  %p498_p12 = pnand %p497_p11, %p491_p8 }
  0x20   :  { %425 = vmatprep.subr.bf16.mxu0 %v519_v0 }
  0x22   :  { %408 = vmatpush3.bf16.msra.mxu1 %v451_v7 }
  0x23   :  { %409 = vmatprep.subr.bf16.mxu1 %v519_v0  ;;  %426 = vmatpush3.bf16.msra.mxu0 %v458_v14 }
  0x24   :  { %427 = vmatprep.subr.bf16.mxu0 %v519_v0 }
  0x26   :  { %410 = vmatpush3.bf16.msra.mxu1 %v452_v8 }
  0x27   :  { %411 = vmatprep.subr.bf16.mxu1 %v519_v0  ;;  %428 = vmatpush3.bf16.msra.mxu0 %v459_v27 }
  0x28   :  { %429 = vmatprep.subr.bf16.mxu0 %v519_v0 }
  0x2a   :  { %412 = vmatpush3.bf16.msra.mxu1 %v453_v9 }
  0x2b   :  { %413 = vmatprep.subr.bf16.mxu1 %v519_v0  ;;  %430 = vmatpush3.bf16.msra.mxu0 %v460_v28 }
  0x2c   :  { %431 = vmatprep.subr.bf16.mxu0 %v519_v0 }
  0x2e   :  { %414 = vmatpush3.bf16.msra.mxu1 %v454_v10 }
  0x2f   :  { %415 = vmatprep.subr.bf16.mxu1 %v519_v0  ;;  %432 = vmatpush3.bf16.msra.mxu0 %v461_v29 }
  0x30   :  { %433 = vmatprep.subr.bf16.mxu0 %v519_v0 }
  0x32   :  { %416 = vmatpush3.bf16.msra.mxu1 %v455_v11 }
  0x33   :  { %434 = vmatpush3.bf16.msra.mxu0 %v462_v30 }
  0x34   :  { %435 = vmatprep.subr.bf16.mxu0 %v519_v0 }
  0x37   :  { %436 = vmatpush3.bf16.msra.mxu0 %v463_v31 }
  0xec   :  { %v97_v16 = vpop.f32.mrb[0].mxu0 }
  0xed   :  { %v98_v17 = vadd.f32 %v354_v15, %v97_v16  ;;  %v399_v18 = vpop.f32.mrb[1].mxu0 }
  0xee   :  { %v100_v19 = vpop.f32.mrb[2].mxu0 }
  0xef   :  { %v104_v20 = vmul.f32 0.70710677, %v98_v17  ;;  %v400_v21 = vpop.f32.mrb[3].mxu0  ;;  %v103_v23 = vmul.f32 0.5, %v98_v17 }
  0xf1   :  { %464 = verf.f32 %v104_v20 }
  0xfb   :  { %v465_v22 = vpop.eup %464 }
  0xfc   :  { %v106_v24 = vadd.f32 1.0, %v465_v22 }
  0xfe   :  { %v107_v25 = vmul.f32 %v106_v24, %v103_v23 }
 0x100   :  { %v108_v26 = vpack.c.bf16 %v107_v25, %v107_v25 }
 0x102   :  { %418 = vmatmul.mubr.bf16.vlgmr.msra.gmra.mrb[0].mxu1 %v108_v26 }
 0x1d5   :  { %v214_v33 = vpop.f32.mrb[0].mxu1 }
 0x1d6   :  { %v215_v34 = vadd.f32 %v357_v32, %v214_v33  ;;  %v419_v35 = vpop.f32.mrb[1].mxu1 }
 0x1d7   :  { %v217_v36 = vpop.f32.mrb[2].mxu1 }
 0x1d8   :  { %v221_v37 = vmul.f32 0.70710677, %v215_v34  ;;  %v420_v38 = vpop.f32.mrb[3].mxu1  ;;  %v220_v40 = vmul.f32 0.5, %v215_v34 }
 0x1da   :  { %466 = verf.f32 %v221_v37 }
 0x1e4   :  { %v467_v39 = vpop.eup %466 }
 0x1e5   :  { %v223_v41 = vadd.f32 1.0, %v467_v39 }
 0x1e7   :  { %v224_v42 = vmul.f32 %v223_v41, %v220_v40 }
 0x1e9   :  { %v225_v43 = vpack.c.bf16 %v224_v42, %v224_v42 }
 0x1eb   :  { %438 = vmatmul.mubr.bf16.vlgmr.msra.gmra.mrb[4].mxu0 %v225_v43 }
 0x2be   :  { %v331_v45 = vpop.f32.mrb[4].mxu0 }
 0x2bf   :  { %v332_v46 = vadd.f32 %v366_v44, %v331_v45  ;;  %v439_v47 = vpop.f32.mrb[5].mxu0 }
 0x2c0   :  { %v334_v48 = vpop.f32.mrb[6].mxu0 }
 0x2c1   :  { %v440_v49 = vpop.f32.mrb[7].mxu0  ;;  %338 = vst.msk [vmem:[#allocation5] sm:$0xff] %vm337_vm2, %v332_v46 }
 0x2c2   :  { %501 = shalt.err (!%p498_p12)
}
 0x2c3   :  { %s502_s6 = scalar_lea.hbm %s676_s7, 128 }
 0x2c4   :  { %p503_p13 = scmp.ne.s32.totalorder %s676_s7, %s502_s6  ;;  %p506_p0 = scmp.lt.u32.totalorder %s502_s6, %s676_s7 }
 0x2c6   :  { %p508_p1 = pnand %p506_p0, %p503_p13 }
 0x2c8   :  { %511 = shalt.err (!%p508_p1)
}
 0x2c9   :  { %348 = dma.vmem_to_hbm [thread:$0]  %s346_s26, 128, %s676_s7, [#allocation4]  }
 0x2ca   :  { %514 = dma.done.wait [#allocation4], 128  }
 0x2cb   :  { %515 = vsyncadd [#allocation4], 4294967168 }
 0x2cc   :  { %352 = vsyncpa [#allocation3], 1 }
 0x2cd   :  { %353 = vsyncpa [#allocation4], 1 }

// kernel: tpu_custom_call.1
= control target key start
LH: loop header
LB: loop body
LE: loop exit
PB: predicated region body
PF: predicated region fallthrough
CT: control target
= control target key end

     0   :  { %12 = vsyncpa [#allocation3], 0  ;;  %s669_s0 = inlined_call_operand.vmem [shape: f32[8,16], index: 0, kind: input, shape index: {}]   ;;  %s670_s1 = inlined_call_operand.hbm [shape: bf16[16,128], index: 1, kind: input, shape index: {}]   ;;  %s671_s2 = inlined_call_operand.vmem [shape: f32[1,128], index: 2, kind: input, shape index: {}]   ;;  %s672_s3 = inlined_call_operand.vmem [shape: bf16[128,128], index: 3, kind: input, shape index: {}]   ;;  %s673_s4 = inlined_call_operand.vmem [shape: f32[1,128], index: 4, kind: input, shape index: {}]   ;;  %s674_s5 = inlined_call_operand.vmem [shape: bf16[128,8], index: 5, kind: input, shape index: {}]   ;;  %s675_s6 = inlined_call_operand.vmem [shape: f32[1,8], index: 6, kind: input, shape index: {}]   ;;  %s676_s7 = inlined_call_operand.hbm [shape: f32[8,8], index: 7, kind: output, shape index: {}]  }
   0x1   :  { %13 = vsyncpa [#allocation4], 0  ;;  %s516_s24 = smov [#allocation2]   ;;  %s468_s28 = scalar_lea.hbm %s670_s1, 128 }
   0x2   :  { %s21_s25 = sshll.u32 %s516_s24, 4  ;;  %p469_p0 = scmp.ne.s32.totalorder %s670_s1, %s468_s28  ;;  %s22_s25 = int_to_ptr.vmem [resolvable:$true] %s21_s25 }
   0x3   :  { %p472_p1 = scmp.lt.u32.totalorder %s468_s28, %s670_s1 }
   0x5   :  { %p474_p2 = pnand %p472_p1, %p469_p0 }
   0x7   :  { %477 = shalt.err (!%p474_p2)
}
   0x8   :  { %s478_s10 = scalar_lea.vmem %s22_s25, 128  ;;  %p483_p4 = scmp.lt.s32.totalorder %s22_s25, %s22_s25 }
   0x9   :  { %p479_p3 = scmp.ne.s32.totalorder %s22_s25, %s478_s10  ;;  %p484_p5 = scmp.lt.s32.totalorder %s478_s10, %s478_s10 }
   0xb   :  { %p485_p6 = por %p484_p5, %p483_p4 }
   0xd   :  { %p486_p7 = pnand %p485_p6, %p479_p3 }
   0xf   :  { %489 = shalt.err (!%p486_p7)
}
  0x10   :  { %s517_s11 = smov 64   ;;  %s518_s12 = smov 4  }
  0x11   :  { %27 = dma.hbm_to_vmem [thread:$0]  %s670_s1, 128, %s22_s25, [#allocation3], %s517_s11, %s517_s11, %s518_s12  }
  0x12   :  { %512 = dma.done.wait [#allocation3], 128  }
  0x13   :  { %513 = vsyncadd [#allocation3], 4294967168  ;;  %v519_v0 = vmov 0.0   ;;  %vm520_vm0 = vmmov 0   ;;  %v447_v1 = vld [vmem:[#allocation2] sm:$0xff]   ;;  %vm59_vm1 = vcmask 130048  }
  0x14   :  { %395 = vmatprep.subr.bf16.mxu0 %v519_v0  ;;  %397 = vmatprep.mubr.msk.bf16.mxu0 %vm520_vm0, %v519_v0  ;;  %v42_v2 = vld [vmem:[%s669_s0] sm:$0xff]  ;;  %v449_v5 = vld [vmem:[%s672_s3 + $0x8] sm:$0xff]   ;;  %v450_v6 = vld [vmem:[%s672_s3 + $0x10] sm:$0xff]   ;;  %s521_s25 = smov [#allocation5]   ;;  %vm337_vm2 = vcmask 64512  }
  0x15   :  { %401 = vmatprep.subr.bf16.mxu1 %v519_v0  ;;  %417 = vmatprep.mubr.msk.bf16.mxu1 %vm520_vm0, %v519_v0  ;;  %v43_v3 = vpack.c.bf16 %v42_v2, %v42_v2  ;;  %v448_v4 = vld [vmem:[%s672_s3] sm:$0xff]   ;;  %v451_v7 = vld [vmem:[%s672_s3 + $0x18] sm:$0xff]   ;;  %v453_v9 = vld [vmem:[%s672_s3 + $0x28] sm:$0xff]   ;;  %s345_s26 = sshll.u32 %s521_s25, 4  ;;  %s346_s26 = int_to_ptr.vmem [resolvable:$true] %s345_s26 }
  0x16   :  { %396 = vmatpush3.bf16.msra.mxu0 %v447_v1  ;;  %402 = vmatpush3.bf16.msra.mxu1 %v448_v4  ;;  %v452_v8 = vld [vmem:[%s672_s3 + $0x20] sm:$0xff]   ;;  %v454_v10 = vld [vmem:[%s672_s3 + $0x30] sm:$0xff]   ;;  %v455_v11 = vld [vmem:[%s672_s3 + $0x38] sm:$0xff]   ;;  %p495_p9 = scmp.lt.s32.totalorder %s346_s26, %s346_s26 }
  0x17   :  { %421 = vmatprep.subr.bf16.mxu0 %v519_v0  ;;  %403 = vmatprep.subr.bf16.mxu1 %v519_v0  ;;  %v456_v12 = vld [vmem:[%s674_s5] sm:$0xff]   ;;  %v457_v13 = vld [vmem:[%s674_s5 + $0x8] sm:$0xff]   ;;  %v458_v14 = vld [vmem:[%s674_s5 + $0x10] sm:$0xff]  }
  0x18   :  { %v354_v15 = vld [vmem:[%s671_s2] ss:$0 sm:$0xff]  ;;  %v459_v27 = vld [vmem:[%s674_s5 + $0x18] sm:$0xff]   ;;  %v461_v29 = vld [vmem:[%s674_s5 + $0x28] sm:$0xff]  }
  0x19   :  { %398 = vmatmul.mubr.msk.bf16.vlgmr.msra.gmra.mrb[0].mxu0 %vm59_vm1, %v43_v3  ;;  %v460_v28 = vld [vmem:[%s674_s5 + $0x20] sm:$0xff]   ;;  %v462_v30 = vld [vmem:[%s674_s5 + $0x30] sm:$0xff]   ;;  %v463_v31 = vld [vmem:[%s674_s5 + $0x38] sm:$0xff]  }
  0x1a   :  { %437 = vmatprep.mubr.msk.bf16.mxu0 %vm520_vm0, %v519_v0  ;;  %404 = vmatpush3.bf16.msra.mxu1 %v449_v5  ;;  %v357_v32 = vld [vmem:[%s673_s4] ss:$0 sm:$0xff]  ;;  %s490_s4 = scalar_lea.vmem %s346_s26, 128 }
  0x1b   :  { %405 = vmatprep.subr.bf16.mxu1 %v519_v0  ;;  %422 = vmatpush3.bf16.msra.mxu0 %v456_v12  ;;  %v366_v44 = vld [vmem:[%s675_s6] ss:$0 sm:$0xff]  ;;  %p491_p8 = scmp.ne.s32.totalorder %s346_s26, %s490_s4  ;;  %p496_p10 = scmp.lt.s32.totalorder %s490_s4, %s490_s4 }
  0x1c   :  { %423 = vmatprep.subr.bf16.mxu0 %v519_v0 }
  0x1d   :  { %p497_p11 = por %p496_p10, %p495_p9 }
  0x1e   :  { %406 = vmatpush3.bf16.msra.mxu1 %v450_v6 }
  0x1f   :  { %407 = vmatprep.subr.bf16.mxu1 %v519_v0  ;;  %424 = vmatpush3.bf16.msra.mxu0 %v457_v13  ;;  %p498_p12 = pnand %p497_p11, %p491_p8 }
  0x20   :  { %425 = vmatprep.subr.bf16.mxu0 %v519_v0 }
  0x22   :  { %408 = vmatpush3.bf16.msra.mxu1 %v451_v7 }
  0x23   :  { %409 = vmatprep.subr.bf16.mxu1 %v519_v0  ;;  %426 = vmatpush3.bf16.msra.mxu0 %v458_v14 }
  0x24   :  { %427 = vmatprep.subr.bf16.mxu0 %v519_v0 }
  0x26   :  { %410 = vmatpush3.bf16.msra.mxu1 %v452_v8 }
  0x27   :  { %411 = vmatprep.subr.bf16.mxu1 %v519_v0  ;;  %428 = vmatpush3.bf16.msra.mxu0 %v459_v27 }
  0x28   :  { %429 = vmatprep.subr.bf16.mxu0 %v519_v0 }
  0x2a   :  { %412 = vmatpush3.bf16.msra.mxu1 %v453_v9 }
  0x2b   :  { %413 = vmatprep.subr.bf16.mxu1 %v519_v0  ;;  %430 = vmatpush3.bf16.msra.mxu0 %v460_v28 }
  0x2c   :  { %431 = vmatprep.subr.bf16.mxu0 %v519_v0 }
  0x2e   :  { %414 = vmatpush3.bf16.msra.mxu1 %v454_v10 }
  0x2f   :  { %415 = vmatprep.subr.bf16.mxu1 %v519_v0  ;;  %432 = vmatpush3.bf16.msra.mxu0 %v461_v29 }
  0x30   :  { %433 = vmatprep.subr.bf16.mxu0 %v519_v0 }
  0x32   :  { %416 = vmatpush3.bf16.msra.mxu1 %v455_v11 }
  0x33   :  { %434 = vmatpush3.bf16.msra.mxu0 %v462_v30 }
  0x34   :  { %435 = vmatprep.subr.bf16.mxu0 %v519_v0 }
  0x37   :  { %436 = vmatpush3.bf16.msra.mxu0 %v463_v31 }
  0xec   :  { %v97_v16 = vpop.f32.mrb[0].mxu0 }
  0xed   :  { %v98_v17 = vadd.f32 %v354_v15, %v97_v16  ;;  %v399_v18 = vpop.f32.mrb[1].mxu0 }
  0xee   :  { %v100_v19 = vpop.f32.mrb[2].mxu0 }
  0xef   :  { %v104_v20 = vmul.f32 0.70710677, %v98_v17  ;;  %v400_v21 = vpop.f32.mrb[3].mxu0  ;;  %v103_v23 = vmul.f32 0.5, %v98_v17 }
  0xf1   :  { %464 = verf.f32 %v104_v20 }
  0xfb   :  { %v465_v22 = vpop.eup %464 }
  0xfc   :  { %v106_v24 = vadd.f32 1.0, %v465_v22 }
  0xfe   :  { %v107_v25 = vmul.f32 %v106_v24, %v103_v23 }
 0x100   :  { %v108_v26 = vpack.c.bf16 %v107_v25, %v107_v25 }
 0x102   :  { %418 = vmatmul.mubr.bf16.vlgmr.msra.gmra.mrb[0].mxu1 %v108_v26 }
 0x1d5   :  { %v214_v33 = vpop.f32.mrb[0].mxu1 }
 0x1d6   :  { %v215_v34 = vadd.f32 %v357_v32, %v214_v33  ;;  %v419_v35 = vpop.f32.mrb[1].mxu1 }
 0x1d7   :  { %v217_v36 = vpop.f32.mrb[2].mxu1 }
 0x1d8   :  { %v221_v37 = vmul.f32 0.70710677, %v215_v34  ;;  %v420_v38 = vpop.f32.mrb[3].mxu1  ;;  %v220_v40 = vmul.f32 0.5, %v215_v34 }
 0x1da   :  { %466 = verf.f32 %v221_v37 }
 0x1e4   :  { %v467_v39 = vpop.eup %466 }
 0x1e5   :  { %v223_v41 = vadd.f32 1.0, %v467_v39 }
 0x1e7   :  { %v224_v42 = vmul.f32 %v223_v41, %v220_v40 }
 0x1e9   :  { %v225_v43 = vpack.c.bf16 %v224_v42, %v224_v42 }
 0x1eb   :  { %438 = vmatmul.mubr.bf16.vlgmr.msra.gmra.mrb[4].mxu0 %v225_v43 }
 0x2be   :  { %v331_v45 = vpop.f32.mrb[4].mxu0 }
 0x2bf   :  { %v332_v46 = vadd.f32 %v366_v44, %v331_v45  ;;  %v439_v47 = vpop.f32.mrb[5].mxu0 }
 0x2c0   :  { %v334_v48 = vpop.f32.mrb[6].mxu0 }
 0x2c1   :  { %v440_v49 = vpop.f32.mrb[7].mxu0  ;;  %338 = vst.msk [vmem:[#allocation5] sm:$0xff] %vm337_vm2, %v332_v46 }
 0x2c2   :  { %501 = shalt.err (!%p498_p12)
}
 0x2c3   :  { %s502_s6 = scalar_lea.hbm %s676_s7, 128 }
 0x2c4   :  { %p503_p13 = scmp.ne.s32.totalorder %s676_s7, %s502_s6  ;;  %p506_p0 = scmp.lt.u32.totalorder %s502_s6, %s676_s7 }
 0x2c6   :  { %p508_p1 = pnand %p506_p0, %p503_p13 }
 0x2c8   :  { %511 = shalt.err (!%p508_p1)
}
 0x2c9   :  { %348 = dma.vmem_to_hbm [thread:$0]  %s346_s26, 128, %s676_s7, [#allocation4]  }
 0x2ca   :  { %514 = dma.done.wait [#allocation4], 128  }
 0x2cb   :  { %515 = vsyncadd [#allocation4], 4294967168 }
 0x2cc   :  { %352 = vsyncpa [#allocation3], 1 }
 0x2cd   :  { %353 = vsyncpa [#allocation4], 1 }

</bundles_post_ra>
